<compile_context>
chip_gen: v6e
topology: v6e:2x2x1
jax: 0.10.0
libtpu: 0.0.40
codegen_flags: <defaults>
</compile_context>

<pallas_src>
import functools
import math

import jax
import jax.numpy as jnp
from jax.experimental import pallas as pl
from jax.experimental.pallas import tpu as pltpu

LN_EPS = 1e-5


# ------------------ shared math (used by the kernel AND the references) ------

def _layer_norm(v, w, b):
    # Single-pass mean / mean-of-squares (keeps rsqrt on the EUP slot).
    mu = jnp.mean(v, axis=-1, keepdims=True)
    ms = jnp.mean(v * v, axis=-1, keepdims=True)
    var = ms - mu * mu
    return (v - mu) * jax.lax.rsqrt(var + LN_EPS) * w + b


def _gelu(x):
    # TODO(synk): torch F.gelu defaults to the exact erf GELU; the tanh
    # approximation is used here (EUP-friendly on TPU).
    return jax.nn.gelu(x, approximate=True)


def _encoder_layer(x, cd, sd, cs, ss, lnp, fc1_w, fc1_b, fc2_w, *,
                   tb, L, mm_dtype, act_dtype, ff_chunk):
    """One FnetEncoderLayer (norm_first=True) on a (tb*L, D) f32 slab."""
    ln1_w, ln1_b = lnp[0:1], lnp[1:2]
    lnf_w, lnf_b = lnp[2:3], lnp[3:4]
    ln2_w, ln2_b = lnp[4:5], lnp[5:6]
    fc2_b = lnp[6:7]

    # --- Fourier mixing block (self-attention replacement), pre-norm ---
    h = _layer_norm(x, ln1_w, ln1_b)                                  # norm1
    hb = h.astype(mm_dtype)
    # hidden-dim DFT (position-wise -> whole folded slab at once).
    hc = jnp.dot(hb, cd, preferred_element_type=jnp.float32)
    hs = jnp.dot(hb, sd, preferred_element_type=jnp.float32)
    # sequence-dim DFT per folded batch: f_b = Cs @ hc_b - Ss @ hs_b.
    # Statically unrolled over tb (tb small); replaces the old O((tb*L)^2)
    # block-diagonal mixer.  f32 intermediates keep the row slices tile-aligned
    # at small/odd L; at production sizes (L % 16 == 0) hc/hs could be emitted
    # directly in mm_dtype to halve this intermediate.
    if tb == 1:
        f = jnp.dot(cs, hc.astype(mm_dtype), preferred_element_type=jnp.float32)
        f = f - jnp.dot(ss, hs.astype(mm_dtype),
                        preferred_element_type=jnp.float32)
    else:
        parts = []
        for b in range(tb):
            r0, r1 = b * L, (b + 1) * L
            fb = jnp.dot(cs, hc[r0:r1].astype(mm_dtype),
                         preferred_element_type=jnp.float32)
            fb = fb - jnp.dot(ss, hs[r0:r1].astype(mm_dtype),
                              preferred_element_type=jnp.float32)
            parts.append(fb)
        f = jnp.concatenate(parts, axis=0)
    sa = _layer_norm(h + f, lnf_w, lnf_b)           # FNetBasicOutput LayerNorm
    x = x + sa                                      # dropout1 == identity

    # --- feed-forward Mlp: fc1 -> gelu -> fc2 (dropouts == identity) ---
    h2 = _layer_norm(x, ln2_w, ln2_b)                                 # norm2
    n = h2.shape[0]
    if n <= ff_chunk:
        row_chunks = [h2]
    else:  # bound the (rows, d_inner) GELU intermediate
        row_chunks = [h2[r0:r0 + ff_chunk] for r0 in range(0, n, ff_chunk)]
    ff_parts = []
    for hck in row_chunks:
        z = jnp.dot(hck.astype(mm_dtype), fc1_w,
                    preferred_element_type=act_dtype)
        z = z + fc1_b.astype(act_dtype)
        z = _gelu(z)
        ff_parts.append(jnp.dot(z.astype(mm_dtype), fc2_w,
                                preferred_element_type=jnp.float32))
    ff = ff_parts[0] if len(ff_parts) == 1 else jnp.concatenate(ff_parts, 0)
    return x + ff + fc2_b


def _head(feats, ln_w, ln_b, w1, b1, w2, b2, *, mm_dtype):
    """Encoder-final LayerNorm on the CLS rows + Linear -> ReLU -> Linear."""
    feats = _layer_norm(feats, ln_w, ln_b)
    z = jnp.dot(feats.astype(mm_dtype), w1,
                preferred_element_type=jnp.float32) + b1
    z = jnp.maximum(z, 0.0)
    return jnp.dot(z.astype(mm_dtype), w2,
                   preferred_element_type=jnp.float32) + b2


# ------------------------------ fused Pallas kernel --------------------------

def fnet_fused_kernel(x_ref, cd_ref, sd_ref, cs_ref, ss_ref, lnp_ref,
                      fc1w_ref, fc1b_ref, fc2w_ref, hln_ref, hw1_ref, hb1_ref,
                      hw2_ref, hb2_ref, o_ref, h_scratch,
                      *, tb, L, D, n_layer, mm_dtype, act_dtype, ff_chunk):
    layer = pl.program_id(1)

    @pl.when(layer == 0)
    def _():
        # bf16 input is upcast ONCE into the resident f32 hidden-state scratch.
        h_scratch[...] = x_ref[0].astype(jnp.float32)

    x = _encoder_layer(h_scratch[...], cd_ref[...], sd_ref[...], cs_ref[...],
                       ss_ref[...], lnp_ref[0], fc1w_ref[0], fc1b_ref[0],
                       fc2w_ref[0], tb=tb, L=L, mm_dtype=mm_dtype,
                       act_dtype=act_dtype, ff_chunk=ff_chunk)
    h_scratch[...] = x

    @pl.when(layer == n_layer - 1)
    def _():
        # CLS pooling: strided ref read of rows 0, L, 2L, ... (no reshape copy).
        if tb == 1:
            feats = h_scratch[0:1, :]
        else:
            feats = h_scratch[pl.ds(0, tb, stride=L), :]
        hln = hln_ref[...]
        logits = _head(feats, hln[0:1], hln[1:2], hw1_ref[...], hb1_ref[...],
                       hw2_ref[...], hb2_ref[...], mm_dtype=mm_dtype)
        o_ref[0] = logits.astype(o_ref.dtype)


# ------------------------------ wrappers -------------------------------------

def dft_real_imag(n):
    k = jnp.arange(n, dtype=jnp.float32)
    ang = 2.0 * jnp.pi * jnp.outer(k, k) / n
    return jnp.cos(ang), jnp.sin(ang)


def sinusoidal_pe(max_len, d_model):
    # TODO(synk): PositionalEncoding body is not in the provided source; the
    # standard sinusoidal encoding (dropout == identity in eval) is assumed.
    pos = jnp.arange(max_len, dtype=jnp.float32)[:, None]
    div = jnp.exp(jnp.arange(0, d_model, 2, dtype=jnp.float32)
                  * (-math.log(10000.0) / d_model))
    pe = jnp.zeros((max_len, d_model), dtype=jnp.float32)
    pe = pe.at[:, 0::2].set(jnp.sin(pos * div))
    pe = pe.at[:, 1::2].set(jnp.cos(pos * div))
    return pe


def _spec(shape, index_map, *, buffers=None):
    """BlockSpec, optionally with explicit buffer count (single-buffer the
    constant-index operands).  Falls back gracefully if this jax version does
    not expose pipeline_mode/Buffered."""
    if buffers is not None:
        try:
            return pl.BlockSpec(shape, index_map,
                                pipeline_mode=pl.Buffered(buffers))
        except Exception:
            pass
    return pl.BlockSpec(shape, index_map)


def tpu_generation_config():
    """Generation-aware kernel knobs (v5e / v6e / v7x)."""
    kind = ""
    try:
        kind = jax.devices()[0].device_kind.lower()
    except Exception:
        pass
    vmem = None
    try:
        vmem = int(getattr(pltpu.get_tpu_info(), "vmem_capacity_bytes", 0)) or None
    except Exception:
        pass

    is_v7 = ("v7" in kind) or ("tpu7" in kind)
    is_v6 = "v6" in kind
    is_v5e = ("v5e" in kind) or ("v5 lite" in kind) or ("v5lite" in kind)

    if is_v7:      # 2 TensorCores / 64 MiB VMEM per core
        cfg = dict(num_batch_tiles=2, vmem_limit_bytes=48 << 20,
                   act_dtype=jnp.bfloat16, ff_chunk=512)
    elif is_v6:    # 1 TensorCore / 128 MiB, bf16 VPU+EUP
        cfg = dict(num_batch_tiles=1, vmem_limit_bytes=96 << 20,
                   act_dtype=jnp.bfloat16, ff_chunk=1024)
    elif is_v5e:   # 1 TensorCore / 128 MiB, no bf16 VALU/EUP -> f32 GELU
        cfg = dict(num_batch_tiles=1, vmem_limit_bytes=96 << 20,
                   act_dtype=jnp.float32, ff_chunk=512)
    else:          # unknown generation: conservative settings
        cfg = dict(num_batch_tiles=1, vmem_limit_bytes=32 << 20,
                   act_dtype=jnp.float32, ff_chunk=512)
    if vmem is not None:  # leave headroom for internal scratch
        cfg["vmem_limit_bytes"] = min(cfg["vmem_limit_bytes"], int(0.75 * vmem))
    return cfg


def build_encoder_operands(x, layers, head, *, num_batch_tiles, mm_dtype):
    """Reshape / pack / pre-cast everything the fused kernel consumes."""
    B, L, D = x.shape
    if num_batch_tiles < 1 or B % num_batch_tiles != 0:
        num_batch_tiles = 1
    tb = B // num_batch_tiles

    cs, ss = dft_real_imag(L)
    cd, sd = dft_real_imag(D)
    ops = dict(
        # Input stored in bf16; upcast once into the f32 scratch at layer 0.
        x_tiled=x.reshape(num_batch_tiles, tb * L, D).astype(mm_dtype),
        cd=cd.astype(mm_dtype), sd=sd.astype(mm_dtype),
        cs=cs.astype(mm_dtype), ss=ss.astype(mm_dtype),
        lnp=layers["lnp"],
        fc1_w=layers["fc1_w"].astype(mm_dtype),
        fc1_b=layers["fc1_b"],
        fc2_w=layers["fc2_w"].astype(mm_dtype),
        hln=head["ln"],
        hw1=head["w1"].astype(mm_dtype), hb1=head["b1"],
        hw2=head["w2"].astype(mm_dtype), hb2=head["b2"],
    )
    return ops, tb, num_batch_tiles


def fnet_encoder_classifier_pallas(ops, *, tb, L, D, mm_dtype, act_dtype,
                                   ff_chunk, vmem_limit_bytes):
    num_bt = ops["x_tiled"].shape[0]
    n_layer = ops["lnp"].shape[0]
    H = ops["fc1_w"].shape[-1]
    C = ops["hw2"].shape[-1]

    def const(shape):           # never changes across the grid -> single buffer
        n = len(shape)
        return _spec(shape, lambda bt, l, _n=n: (0,) * _n, buffers=1)

    def per_layer(shape):       # re-DMA'd each layer step -> default pipeline
        n = len(shape)
        return _spec((1,) + shape, lambda bt, l, _n=n: (l,) + (0,) * _n)

    kernel = functools.partial(fnet_fused_kernel, tb=tb, L=L, D=D,
                               n_layer=n_layer, mm_dtype=mm_dtype,
                               act_dtype=act_dtype, ff_chunk=ff_chunk)

    out = pl.pallas_call(
        kernel,
        out_shape=jax.ShapeDtypeStruct((num_bt, tb, C), jnp.float32),
        grid_spec=pltpu.PrefetchScalarGridSpec(
            num_scalar_prefetch=0,
            grid=(num_bt, n_layer),                 # layer (reduction) axis last
            in_specs=[
                _spec((1, tb * L, D), lambda bt, l: (bt, 0, 0), buffers=1),  # x
                const((D, D)), const((D, D)),       # hidden-dim DFT Cd, Sd
                const((L, L)), const((L, L)),       # seq-dim   DFT Cs, Ss
                per_layer((8, D)),                  # packed LN params + fc2_b
                per_layer((D, H)),                  # fc1 weight
                per_layer((1, H)),                  # fc1 bias
                per_layer((H, D)),                  # fc2 weight
                const((2, D)),                      # encoder-final LayerNorm
                const((D, H)), const((1, H)),       # head fc1
                const((H, C)), const((1, C)),       # head fc2
            ],
            # TODO(synk): pad the logits lane dim toward 128 for unmasked vst
            # when num_classes is large enough to matter (C=4 is negligible).
            out_specs=pl.BlockSpec((1, tb, C), lambda bt, l: (bt, 0, 0)),
            scratch_shapes=[pltpu.VMEM((tb * L, D), jnp.float32)],
        ),
        compiler_params=pltpu.CompilerParams(
            dimension_semantics=("parallel", "arbitrary"),
            vmem_limit_bytes=int(vmem_limit_bytes),
        ),
    )(ops["x_tiled"], ops["cd"], ops["sd"], ops["cs"], ops["ss"], ops["lnp"],
      ops["fc1_w"], ops["fc1_b"], ops["fc2_w"], ops["hln"], ops["hw1"],
      ops["hb1"], ops["hw2"], ops["hb2"])
    return out.reshape(num_bt * tb, C)


# ------------------------------ pure-JAX references --------------------------

def fnet_encoder_classifier_ref(ops, *, tb, L, D, mm_dtype, act_dtype,
                                ff_chunk):
    """Same mixed-precision math as the kernel, in plain JAX."""
    num_bt = ops["x_tiled"].shape[0]
    n_layer = ops["lnp"].shape[0]
    outs = []
    for bt in range(num_bt):
        h = ops["x_tiled"][bt].astype(jnp.float32)
        for l in range(n_layer):
            h = _encoder_layer(h, ops["cd"], ops["sd"], ops["cs"], ops["ss"],
                               ops["lnp"][l], ops["fc1_w"][l], ops["fc1_b"][l],
                               ops["fc2_w"][l], tb=tb, L=L, mm_dtype=mm_dtype,
                               act_dtype=act_dtype, ff_chunk=ff_chunk)
        feats = h.reshape(tb, L, D)[:, 0, :]
        outs.append(_head(feats, ops["hln"][0:1], ops["hln"][1:2], ops["hw1"],
                          ops["hb1"], ops["hw2"], ops["hb2"],
                          mm_dtype=mm_dtype))
    return jnp.concatenate(outs, axis=0)


def fnet_classifier_ref_f32(x, layers, head, *, L, D):
    """Full-f32 reference of the same forward math (fidelity check)."""
    B = x.shape[0]
    f32 = jnp.float32
    cs, ss = dft_real_imag(L)
    cd, sd = dft_real_imag(D)
    h = x.reshape(B * L, D).astype(f32)
    for l in range(layers["lnp"].shape[0]):
        h = _encoder_layer(h, cd, sd, cs, ss, layers["lnp"][l],
                           layers["fc1_w"][l], layers["fc1_b"][l],
                           layers["fc2_w"][l], tb=B, L=L, mm_dtype=f32,
                           act_dtype=f32, ff_chunk=1 << 30)
    feats = h.reshape(B, L, D)[:, 0, :]
    hln = head["ln"]
    return _head(feats, hln[0:1], hln[1:2], head["w1"], head["b1"],
                 head["w2"], head["b2"], mm_dtype=f32)


# ------------------------------ params / forward -----------------------------

def init_params(key, *, d_model, d_inner, n_layer, num_classes, vocab_size,
                pad_token_id):
    """Deterministic synthetic init (non-zero biases / LN params so the packed
    lnp slab indexing and bias adds are numerically exercised)."""
    def rnd(k, shape, scale):
        return (scale * jax.random.normal(k, shape)).astype(jnp.float32)

    ks = jax.random.split(key, 8)
    emb = rnd(ks[0], (vocab_size, d_model), 1.0)
    emb = emb.at[pad_token_id].set(0.0)                  # padding_idx row = 0

    fc1_w = jnp.stack([rnd(jax.random.fold_in(ks[1], i), (d_model, d_inner), 0.05)
                       for i in range(n_layer)])
    fc2_w = jnp.stack([rnd(jax.random.fold_in(ks[2], i), (d_inner, d_model), 0.05)
                       for i in range(n_layer)])
    fc1_b = jnp.stack([rnd(jax.random.fold_in(ks[3], i), (1, d_inner), 0.02)
                       for i in range(n_layer)])
    fc2_b = jnp.stack([rnd(jax.random.fold_in(ks[4], i), (1, d_model), 0.02)
                       for i in range(n_layer)])

    def ln_w(k):
        return (1.0 + 0.05 * jax.random.normal(k, (1, d_model))).astype(jnp.float32)

    def ln_b(k):
        return (0.02 * jax.random.normal(k, (1, d_model))).astype(jnp.float32)

    # Packed (n_layer, 8, D) slab:
    #   rows = [ln1_w, ln1_b, fourierLN_w, fourierLN_b, ln2_w, ln2_b, fc2_b, pad]
    lnp_rows = []
    for i in range(n_layer):
        kk = jax.random.split(jax.random.fold_in(ks[5], i), 6)
        lnp_rows.append(jnp.concatenate(
            [ln_w(kk[0]), ln_b(kk[1]), ln_w(kk[2]), ln_b(kk[3]),
             ln_w(kk[4]), ln_b(kk[5]), fc2_b[i],
             jnp.zeros((1, d_model), jnp.float32)], axis=0))
    lnp = jnp.stack(lnp_rows)

    kh = jax.random.split(ks[6], 6)
    # TODO(synk): ClassificationHead/Mlp bodies are not in the provided source;
    # CLS pooling -> Linear(d_model, d_inner) -> ReLU -> Linear(d_inner,
    # num_classes) is assumed, preceded by the FNet encoder-final LayerNorm.
    head = dict(
        ln=jnp.concatenate([ln_w(kh[0]), ln_b(kh[1])], axis=0),
        w1=rnd(kh[2], (d_model, d_inner), 0.2),
        b1=rnd(kh[3], (1, d_inner), 0.02),
        w2=rnd(kh[4], (d_inner, num_classes), 0.2),
        b2=rnd(kh[5], (1, num_classes), 0.02),
    )
    return dict(emb=emb, cls=jnp.zeros((1, 1, d_model), jnp.float32),
                layers=dict(lnp=lnp, fc1_w=fc1_w, fc1_b=fc1_b, fc2_w=fc2_w),
                head=head)


def embed_inputs(tokens, params, pe):
    # Embedding gather + CLS concat + positional encoding stay in plain JAX.
    B, S = tokens.shape
    D = params["emb"].shape[1]
    x = params["emb"][tokens]                                # word_emb (B, S, D)
    cls = jnp.broadcast_to(params["cls"], (B, 1, D))         # CLS token
    x = jnp.concatenate([cls, x], axis=1)                    # (B, L, D)
    return x + pe[None, : S + 1, :]                          # pos_encoder


def fnet_classifier_forward(tokens, params, pe, *, cfg, mm_dtype=jnp.bfloat16):
    x = embed_inputs(tokens, params, pe)
    B, L, D = x.shape
    ops, tb, _ = build_encoder_operands(x, params["layers"], params["head"],
                                        num_batch_tiles=cfg["num_batch_tiles"],
                                        mm_dtype=mm_dtype)
    return fnet_encoder_classifier_pallas(
        ops, tb=tb, L=L, D=D, mm_dtype=mm_dtype, act_dtype=cfg["act_dtype"],
        ff_chunk=cfg["ff_chunk"], vmem_limit_bytes=cfg["vmem_limit_bytes"])


# ----------------------------------- main ------------------------------------

if __name__ == "__main__":
    d_model, d_inner, n_layer = 32, 64, 2
    num_classes, vocab_size, pad_token_id, max_len = 4, 50, 0, 16
    B, S = 2, 7
    L = S + 1  # CLS token prepended

    key = jax.random.PRNGKey(0)
    pkey, tkey = jax.random.split(key)
    params = init_params(pkey, d_model=d_model, d_inner=d_inner,
                         n_layer=n_layer, num_classes=num_classes,
                         vocab_size=vocab_size, pad_token_id=pad_token_id)
    pe = sinusoidal_pe(max_len, d_model)
    tokens = jax.random.randint(tkey, (B, S), 0, vocab_size, dtype=jnp.int32)

    cfg = tpu_generation_config()
    fwd = jax.jit(functools.partial(fnet_classifier_forward, cfg=cfg))
    logits = fwd(tokens, params, pe)
    jax.block_until_ready(logits)
    assert logits.shape == (B, num_classes)

    # Check 1: plain-JAX reference with the *same* mixed-precision math.
    x = embed_inputs(tokens, params, pe)
    ops, tb, _ = build_encoder_operands(x, params["layers"], params["head"],
                                        num_batch_tiles=cfg["num_batch_tiles"],
                                        mm_dtype=jnp.bfloat16)
    ref_mixed = fnet_encoder_classifier_ref(
        ops, tb=tb, L=L, D=d_model, mm_dtype=jnp.bfloat16,
        act_dtype=cfg["act_dtype"], ff_chunk=cfg["ff_chunk"])
    err_mixed = float(jnp.max(jnp.abs(logits - ref_mixed)))
    assert err_mixed < 5e-2, f"mixed-precision reference mismatch: {err_mixed}"

    # Check 2: full-f32 reference (validates bf16-path fidelity, loose tol).
    ref_f32 = fnet_classifier_ref_f32(x, params["layers"], params["head"],
                                      L=L, D=d_model)
    err_f32 = float(jnp.max(jnp.abs(logits - ref_f32)))
    assert err_f32 < 2e-1, f"f32 reference mismatch: {err_f32}"

    print("KERNEL_OK")
</pallas_src>

<mosaic_0001>
module attributes {stable_mosaic.version = 11 : i64} {
  func.func @fnet_fused_kernel(%arg0: i32, %arg1: i32, %arg2: memref<1x16x32xbf16, #tpu.memory_space<vmem>>, %arg3: memref<32x32xbf16, #tpu.memory_space<vmem>>, %arg4: memref<32x32xbf16, #tpu.memory_space<vmem>>, %arg5: memref<8x8xbf16, #tpu.memory_space<vmem>>, %arg6: memref<8x8xbf16, #tpu.memory_space<vmem>>, %arg7: memref<1x8x32xf32, #tpu.memory_space<vmem>>, %arg8: memref<1x32x64xbf16, #tpu.memory_space<vmem>>, %arg9: memref<1x1x64xf32, #tpu.memory_space<vmem>>, %arg10: memref<1x64x32xbf16, #tpu.memory_space<vmem>>, %arg11: memref<2x32xf32, #tpu.memory_space<vmem>>, %arg12: memref<32x64xbf16, #tpu.memory_space<vmem>>, %arg13: memref<1x64xf32, #tpu.memory_space<vmem>>, %arg14: memref<64x4xbf16, #tpu.memory_space<vmem>>, %arg15: memref<1x4xf32, #tpu.memory_space<vmem>>, %arg16: memref<1x2x4xf32, #tpu.memory_space<vmem>>, %arg17: memref<16x32xf32, #tpu.memory_space<vmem>>) attributes {dimension_semantics = [#tpu.dimension_semantics<parallel>, #tpu.dimension_semantics<arbitrary>], iteration_bounds = array<i64: 1, 2>, scalar_prefetch = 0 : i64, scratch_operands = 1 : i64, tpu.core_type = #tpu.core_type<tc>, window_params = [{pipeline_mode = #tpu.pipeline_mode<synchronous>, transform_indices = @transform_0, window_bounds = array<i64: 1, 16, 32>}, {pipeline_mode = #tpu.pipeline_mode<synchronous>, transform_indices = @transform_1, window_bounds = array<i64: 32, 32>}, {pipeline_mode = #tpu.pipeline_mode<synchronous>, transform_indices = @transform_2, window_bounds = array<i64: 32, 32>}, {pipeline_mode = #tpu.pipeline_mode<synchronous>, transform_indices = @transform_3, window_bounds = array<i64: 8, 8>}, {pipeline_mode = #tpu.pipeline_mode<synchronous>, transform_indices = @transform_4, window_bounds = array<i64: 8, 8>}, {transform_indices = @transform_5, window_bounds = array<i64: 1, 8, 32>}, {transform_indices = @transform_6, window_bounds = array<i64: 1, 32, 64>}, {transform_indices = @transform_7, window_bounds = array<i64: 1, 1, 64>}, {transform_indices = @transform_8, window_bounds = array<i64: 1, 64, 32>}, {pipeline_mode = #tpu.pipeline_mode<synchronous>, transform_indices = @transform_9, window_bounds = array<i64: 2, 32>}, {pipeline_mode = #tpu.pipeline_mode<synchronous>, transform_indices = @transform_10, window_bounds = array<i64: 32, 64>}, {pipeline_mode = #tpu.pipeline_mode<synchronous>, transform_indices = @transform_11, window_bounds = array<i64: 1, 64>}, {pipeline_mode = #tpu.pipeline_mode<synchronous>, transform_indices = @transform_12, window_bounds = array<i64: 64, 4>}, {pipeline_mode = #tpu.pipeline_mode<synchronous>, transform_indices = @transform_13, window_bounds = array<i64: 1, 4>}, {transform_indices = @transform_14, window_bounds = array<i64: 1, 2, 4>}]} {
    %c0_i32 = arith.constant 0 : i32
    %0 = arith.cmpi eq, %arg1, %c0_i32 : i32
    %1 = arith.extui %0 : i1 to i32
    %c0_i32_0 = arith.constant 0 : i32
    %2 = arith.cmpi ne, %1, %c0_i32_0 : i32
    scf.if %2 {
      %c0_51 = arith.constant 0 : index
      %c0_52 = arith.constant 0 : index
      %c0_53 = arith.constant 0 : index
      %135 = vector.load %arg2[%c0_51, %c0_52, %c0_53] : memref<1x16x32xbf16, #tpu.memory_space<vmem>>, vector<1x16x32xbf16>
      %136 = vector.shape_cast %135 : vector<1x16x32xbf16> to vector<16x32xbf16>
      %137 = arith.extf %136 : vector<16x32xbf16> to vector<16x32xf32>
      %c0_54 = arith.constant 0 : index
      %c0_55 = arith.constant 0 : index
      %138 = vector.load %arg17[%c0_54, %c0_55] : memref<16x32xf32, #tpu.memory_space<vmem>>, vector<16x32xf32>
      tpu.vector_store %arg17[%c0_54, %c0_55], %137 {strides = array<i32>} : memref<16x32xf32, #tpu.memory_space<vmem>>, vector<16x32xf32>,
    } else {
    }
    %c0 = arith.constant 0 : index
    %c0_1 = arith.constant 0 : index
    %3 = vector.load %arg17[%c0, %c0_1] : memref<16x32xf32, #tpu.memory_space<vmem>>, vector<16x32xf32>
    %c0_2 = arith.constant 0 : index
    %c0_3 = arith.constant 0 : index
    %4 = vector.load %arg3[%c0_2, %c0_3] : memref<32x32xbf16, #tpu.memory_space<vmem>>, vector<32x32xbf16>
    %c0_4 = arith.constant 0 : index
    %c0_5 = arith.constant 0 : index
    %5 = vector.load %arg4[%c0_4, %c0_5] : memref<32x32xbf16, #tpu.memory_space<vmem>>, vector<32x32xbf16>
    %c0_6 = arith.constant 0 : index
    %c0_7 = arith.constant 0 : index
    %6 = vector.load %arg5[%c0_6, %c0_7] : memref<8x8xbf16, #tpu.memory_space<vmem>>, vector<8x8xbf16>
    %c0_8 = arith.constant 0 : index
    %c0_9 = arith.constant 0 : index
    %7 = vector.load %arg6[%c0_8, %c0_9] : memref<8x8xbf16, #tpu.memory_space<vmem>>, vector<8x8xbf16>
    %c0_10 = arith.constant 0 : index
    %c0_11 = arith.constant 0 : index
    %c0_12 = arith.constant 0 : index
    %8 = vector.load %arg7[%c0_10, %c0_11, %c0_12] : memref<1x8x32xf32, #tpu.memory_space<vmem>>, vector<1x8x32xf32>
    %9 = vector.shape_cast %8 : vector<1x8x32xf32> to vector<8x32xf32>
    %c0_13 = arith.constant 0 : index
    %c0_14 = arith.constant 0 : index
    %c0_15 = arith.constant 0 : index
    %10 = vector.load %arg8[%c0_13, %c0_14, %c0_15] : memref<1x32x64xbf16, #tpu.memory_space<vmem>>, vector<1x32x64xbf16>
    %11 = vector.shape_cast %10 : vector<1x32x64xbf16> to vector<32x64xbf16>
    %c0_16 = arith.constant 0 : index
    %c0_17 = arith.constant 0 : index
    %c0_18 = arith.constant 0 : index
    %12 = vector.load %arg9[%c0_16, %c0_17, %c0_18] : memref<1x1x64xf32, #tpu.memory_space<vmem>>, vector<1x1x64xf32>
    %13 = vector.shape_cast %12 : vector<1x1x64xf32> to vector<1x64xf32>
    %c0_19 = arith.constant 0 : index
    %c0_20 = arith.constant 0 : index
    %c0_21 = arith.constant 0 : index
    %14 = vector.load %arg10[%c0_19, %c0_20, %c0_21] : memref<1x64x32xbf16, #tpu.memory_space<vmem>>, vector<1x64x32xbf16>
    %15 = vector.shape_cast %14 : vector<1x64x32xbf16> to vector<64x32xbf16>
    %16 = vector.extract_strided_slice %9 {offsets = [0, 0], sizes = [1, 32], strides = [1, 1]} : vector<8x32xf32> to vector<1x32xf32>
    %17 = vector.extract_strided_slice %9 {offsets = [1, 0], sizes = [1, 32], strides = [1, 1]} : vector<8x32xf32> to vector<1x32xf32>
    %18 = vector.extract_strided_slice %9 {offsets = [2, 0], sizes = [1, 32], strides = [1, 1]} : vector<8x32xf32> to vector<1x32xf32>
    %19 = vector.extract_strided_slice %9 {offsets = [3, 0], sizes = [1, 32], strides = [1, 1]} : vector<8x32xf32> to vector<1x32xf32>
    %20 = vector.extract_strided_slice %9 {offsets = [4, 0], sizes = [1, 32], strides = [1, 1]} : vector<8x32xf32> to vector<1x32xf32>
    %21 = vector.extract_strided_slice %9 {offsets = [5, 0], sizes = [1, 32], strides = [1, 1]} : vector<8x32xf32> to vector<1x32xf32>
    %22 = vector.extract_strided_slice %9 {offsets = [6, 0], sizes = [1, 32], strides = [1, 1]} : vector<8x32xf32> to vector<1x32xf32>
    %cst = arith.constant dense<0.000000e+00> : vector<16xf32>
    %23 = vector.multi_reduction <add>, %3, %cst [1] : vector<16x32xf32> to vector<16xf32>
    %24 = vector.shape_cast %23 : vector<16xf32> to vector<16x1xf32>
    %cst_22 = arith.constant 3.200000e+01 : f32
    %25 = vector.broadcast %cst_22 : f32 to vector<16x1xf32>
    %26 = arith.divf %24, %25 : vector<16x1xf32>
    %27 = arith.mulf %3, %3 : vector<16x32xf32>
    %cst_23 = arith.constant dense<0.000000e+00> : vector<16xf32>
    %28 = vector.multi_reduction <add>, %27, %cst_23 [1] : vector<16x32xf32> to vector<16xf32>
    %29 = vector.shape_cast %28 : vector<16xf32> to vector<16x1xf32>
    %cst_24 = arith.constant 3.200000e+01 : f32
    %30 = vector.broadcast %cst_24 : f32 to vector<16x1xf32>
    %31 = arith.divf %29, %30 : vector<16x1xf32>
    %32 = arith.mulf %26, %26 : vector<16x1xf32>
    %33 = arith.subf %31, %32 : vector<16x1xf32>
    %34 = vector.broadcast %26 : vector<16x1xf32> to vector<16x32xf32>
    %35 = arith.subf %3, %34 : vector<16x32xf32>
    %cst_25 = arith.constant 9.99999974E-6 : f32
    %36 = vector.broadcast %cst_25 : f32 to vector<16x1xf32>
    %37 = arith.addf %33, %36 : vector<16x1xf32>
    %38 = math.rsqrt %37 : vector<16x1xf32>
    %39 = vector.broadcast %38 : vector<16x1xf32> to vector<16x32xf32>
    %40 = arith.mulf %35, %39 : vector<16x32xf32>
    %41 = vector.broadcast %16 : vector<1x32xf32> to vector<16x32xf32>
    %42 = arith.mulf %40, %41 : vector<16x32xf32>
    %43 = vector.broadcast %17 : vector<1x32xf32> to vector<16x32xf32>
    %44 = arith.addf %42, %43 : vector<16x32xf32>
    %45 = arith.truncf %44 : vector<16x32xf32> to vector<16x32xbf16>
    %cst_26 = arith.constant dense<0.000000e+00> : vector<16x32xf32>
    %46 = tpu.matmul %45, %4, %cst_26 {dimension_numbers = #tpu.dot_dimension_numbers<[1], [0], [0], [1], [0, 0, 1, 1], [], []>} : vector<16x32xbf16>, vector<32x32xbf16>, vector<16x32xf32> -> vector<16x32xf32>
    %cst_27 = arith.constant dense<0.000000e+00> : vector<16x32xf32>
    %47 = tpu.matmul %45, %5, %cst_27 {dimension_numbers = #tpu.dot_dimension_numbers<[1], [0], [0], [1], [0, 0, 1, 1], [], []>} : vector<16x32xbf16>, vector<32x32xbf16>, vector<16x32xf32> -> vector<16x32xf32>
    %48 = vector.extract_strided_slice %46 {offsets = [0, 0], sizes = [8, 32], strides = [1, 1]} : vector<16x32xf32> to vector<8x32xf32>
    %49 = arith.truncf %48 : vector<8x32xf32> to vector<8x32xbf16>
    %cst_28 = arith.constant dense<0.000000e+00> : vector<8x32xf32>
    %50 = tpu.matmul %6, %49, %cst_28 {dimension_numbers = #tpu.dot_dimension_numbers<[1], [0], [0], [1], [0, 0, 1, 1], [], []>} : vector<8x8xbf16>, vector<8x32xbf16>, vector<8x32xf32> -> vector<8x32xf32>
    %51 = vector.extract_strided_slice %47 {offsets = [0, 0], sizes = [8, 32], strides = [1, 1]} : vector<16x32xf32> to vector<8x32xf32>
    %52 = arith.truncf %51 : vector<8x32xf32> to vector<8x32xbf16>
    %cst_29 = arith.constant dense<0.000000e+00> : vector<8x32xf32>
    %53 = tpu.matmul %7, %52, %cst_29 {dimension_numbers = #tpu.dot_dimension_numbers<[1], [0], [0], [1], [0, 0, 1, 1], [], []>} : vector<8x8xbf16>, vector<8x32xbf16>, vector<8x32xf32> -> vector<8x32xf32>
    %54 = arith.subf %50, %53 : vector<8x32xf32>
    %55 = vector.extract_strided_slice %46 {offsets = [8, 0], sizes = [8, 32], strides = [1, 1]} : vector<16x32xf32> to vector<8x32xf32>
    %56 = arith.truncf %55 : vector<8x32xf32> to vector<8x32xbf16>
    %cst_30 = arith.constant dense<0.000000e+00> : vector<8x32xf32>
    %57 = tpu.matmul %6, %56, %cst_30 {dimension_numbers = #tpu.dot_dimension_numbers<[1], [0], [0], [1], [0, 0, 1, 1], [], []>} : vector<8x8xbf16>, vector<8x32xbf16>, vector<8x32xf32> -> vector<8x32xf32>
    %58 = vector.extract_strided_slice %47 {offsets = [8, 0], sizes = [8, 32], strides = [1, 1]} : vector<16x32xf32> to vector<8x32xf32>
    %59 = arith.truncf %58 : vector<8x32xf32> to vector<8x32xbf16>
    %cst_31 = arith.constant dense<0.000000e+00> : vector<8x32xf32>
    %60 = tpu.matmul %7, %59, %cst_31 {dimension_numbers = #tpu.dot_dimension_numbers<[1], [0], [0], [1], [0, 0, 1, 1], [], []>} : vector<8x8xbf16>, vector<8x32xbf16>, vector<8x32xf32> -> vector<8x32xf32>
    %61 = arith.subf %57, %60 : vector<8x32xf32>
    %62 = tpu.concatenate %54, %61 in 0 : vector<8x32xf32>, vector<8x32xf32> -> vector<16x32xf32>
    %63 = arith.addf %44, %62 : vector<16x32xf32>
    %cst_32 = arith.constant dense<0.000000e+00> : vector<16xf32>
    %64 = vector.multi_reduction <add>, %63, %cst_32 [1] : vector<16x32xf32> to vector<16xf32>
    %65 = vector.shape_cast %64 : vector<16xf32> to vector<16x1xf32>
    %cst_33 = arith.constant 3.200000e+01 : f32
    %66 = vector.broadcast %cst_33 : f32 to vector<16x1xf32>
    %67 = arith.divf %65, %66 : vector<16x1xf32>
    %68 = arith.mulf %63, %63 : vector<16x32xf32>
    %cst_34 = arith.constant dense<0.000000e+00> : vector<16xf32>
    %69 = vector.multi_reduction <add>, %68, %cst_34 [1] : vector<16x32xf32> to vector<16xf32>
    %70 = vector.shape_cast %69 : vector<16xf32> to vector<16x1xf32>
    %cst_35 = arith.constant 3.200000e+01 : f32
    %71 = vector.broadcast %cst_35 : f32 to vector<16x1xf32>
    %72 = arith.divf %70, %71 : vector<16x1xf32>
    %73 = arith.mulf %67, %67 : vector<16x1xf32>
    %74 = arith.subf %72, %73 : vector<16x1xf32>
    %75 = vector.broadcast %67 : vector<16x1xf32> to vector<16x32xf32>
    %76 = arith.subf %63, %75 : vector<16x32xf32>
    %cst_36 = arith.constant 9.99999974E-6 : f32
    %77 = vector.broadcast %cst_36 : f32 to vector<16x1xf32>
    %78 = arith.addf %74, %77 : vector<16x1xf32>
    %79 = math.rsqrt %78 : vector<16x1xf32>
    %80 = vector.broadcast %79 : vector<16x1xf32> to vector<16x32xf32>
    %81 = arith.mulf %76, %80 : vector<16x32xf32>
    %82 = vector.broadcast %18 : vector<1x32xf32> to vector<16x32xf32>
    %83 = arith.mulf %81, %82 : vector<16x32xf32>
    %84 = vector.broadcast %19 : vector<1x32xf32> to vector<16x32xf32>
    %85 = arith.addf %83, %84 : vector<16x32xf32>
    %86 = arith.addf %3, %85 : vector<16x32xf32>
    %cst_37 = arith.constant dense<0.000000e+00> : vector<16xf32>
    %87 = vector.multi_reduction <add>, %86, %cst_37 [1] : vector<16x32xf32> to vector<16xf32>
    %88 = vector.shape_cast %87 : vector<16xf32> to vector<16x1xf32>
    %cst_38 = arith.constant 3.200000e+01 : f32
    %89 = vector.broadcast %cst_38 : f32 to vector<16x1xf32>
    %90 = arith.divf %88, %89 : vector<16x1xf32>
    %91 = arith.mulf %86, %86 : vector<16x32xf32>
    %cst_39 = arith.constant dense<0.000000e+00> : vector<16xf32>
    %92 = vector.multi_reduction <add>, %91, %cst_39 [1] : vector<16x32xf32> to vector<16xf32>
    %93 = vector.shape_cast %92 : vector<16xf32> to vector<16x1xf32>
    %cst_40 = arith.constant 3.200000e+01 : f32
    %94 = vector.broadcast %cst_40 : f32 to vector<16x1xf32>
    %95 = arith.divf %93, %94 : vector<16x1xf32>
    %96 = arith.mulf %90, %90 : vector<16x1xf32>
    %97 = arith.subf %95, %96 : vector<16x1xf32>
    %98 = vector.broadcast %90 : vector<16x1xf32> to vector<16x32xf32>
    %99 = arith.subf %86, %98 : vector<16x32xf32>
    %cst_41 = arith.constant 9.99999974E-6 : f32
    %100 = vector.broadcast %cst_41 : f32 to vector<16x1xf32>
    %101 = arith.addf %97, %100 : vector<16x1xf32>
    %102 = math.rsqrt %101 : vector<16x1xf32>
    %103 = vector.broadcast %102 : vector<16x1xf32> to vector<16x32xf32>
    %104 = arith.mulf %99, %103 : vector<16x32xf32>
    %105 = vector.broadcast %20 : vector<1x32xf32> to vector<16x32xf32>
    %106 = arith.mulf %104, %105 : vector<16x32xf32>
    %107 = vector.broadcast %21 : vector<1x32xf32> to vector<16x32xf32>
    %108 = arith.addf %106, %107 : vector<16x32xf32>
    %109 = arith.truncf %108 : vector<16x32xf32> to vector<16x32xbf16>
    %cst_42 = arith.constant dense<0.000000e+00> : vector<16x64xf32>
    %110 = tpu.matmul %109, %11, %cst_42 {dimension_numbers = #tpu.dot_dimension_numbers<[1], [0], [0], [1], [0, 0, 1, 1], [], []>} : vector<16x32xbf16>, vector<32x64xbf16>, vector<16x64xf32> -> vector<16x64xf32>
    %111 = vector.broadcast %13 : vector<1x64xf32> to vector<16x64xf32>
    %112 = arith.addf %110, %111 : vector<16x64xf32>
    %113 = arith.mulf %112, %112 : vector<16x64xf32>
    %114 = arith.mulf %112, %113 : vector<16x64xf32>
    %cst_43 = arith.constant 4.471500e-02 : f32
    %115 = vector.broadcast %cst_43 : f32 to vector<16x64xf32>
    %116 = arith.mulf %115, %114 : vector<16x64xf32>
    %117 = arith.addf %112, %116 : vector<16x64xf32>
    %cst_44 = arith.constant 0.797884583 : f32
    %118 = vector.broadcast %cst_44 : f32 to vector<16x64xf32>
    %119 = arith.mulf %118, %117 : vector<16x64xf32>
    %120 = math.tanh %119 : vector<16x64xf32>
    %cst_45 = arith.constant 1.000000e+00 : f32
    %121 = vector.broadcast %cst_45 : f32 to vector<16x64xf32>
    %122 = arith.addf %121, %120 : vector<16x64xf32>
    %cst_46 = arith.constant 5.000000e-01 : f32
    %123 = vector.broadcast %cst_46 : f32 to vector<16x64xf32>
    %124 = arith.mulf %123, %122 : vector<16x64xf32>
    %125 = arith.mulf %112, %124 : vector<16x64xf32>
    %126 = arith.truncf %125 : vector<16x64xf32> to vector<16x64xbf16>
    %cst_47 = arith.constant dense<0.000000e+00> : vector<16x32xf32>
    %127 = tpu.matmul %126, %15, %cst_47 {dimension_numbers = #tpu.dot_dimension_numbers<[1], [0], [0], [1], [0, 0, 1, 1], [], []>} : vector<16x64xbf16>, vector<64x32xbf16>, vector<16x32xf32> -> vector<16x32xf32>
    %128 = arith.addf %86, %127 : vector<16x32xf32>
    %129 = vector.broadcast %22 : vector<1x32xf32> to vector<16x32xf32>
    %130 = arith.addf %128, %129 : vector<16x32xf32>
    %c0_48 = arith.constant 0 : index
    %c0_49 = arith.constant 0 : index
    %131 = vector.load %arg17[%c0_48, %c0_49] : memref<16x32xf32, #tpu.memory_space<vmem>>, vector<16x32xf32>
    tpu.vector_store %arg17[%c0_48, %c0_49], %130 {strides = array<i32>} : memref<16x32xf32, #tpu.memory_space<vmem>>, vector<16x32xf32>,
    %c1_i32 = arith.constant 1 : i32
    %132 = arith.cmpi eq, %arg1, %c1_i32 : i32
    %133 = arith.extui %132 : i1 to i32
    %c0_i32_50 = arith.constant 0 : i32
    %134 = arith.cmpi ne, %133, %c0_i32_50 : i32
    scf.if %134 {
      %c0_51 = arith.constant 0 : index
      %c0_52 = arith.constant 0 : index
      %135 = tpu.strided_load %arg17[%c0_51, %c0_52] {strides = array<i32: 8, 1>} : memref<16x32xf32, #tpu.memory_space<vmem>>, vector<2x32xf32>
      %c0_53 = arith.constant 0 : index
      %c0_54 = arith.constant 0 : index
      %136 = vector.load %arg11[%c0_53, %c0_54] : memref<2x32xf32, #tpu.memory_space<vmem>>, vector<2x32xf32>
      %137 = vector.extract_strided_slice %136 {offsets = [0, 0], sizes = [1, 32], strides = [1, 1]} : vector<2x32xf32> to vector<1x32xf32>
      %138 = vector.extract_strided_slice %136 {offsets = [1, 0], sizes = [1, 32], strides = [1, 1]} : vector<2x32xf32> to vector<1x32xf32>
      %c0_55 = arith.constant 0 : index
      %c0_56 = arith.constant 0 : index
      %139 = vector.load %arg12[%c0_55, %c0_56] : memref<32x64xbf16, #tpu.memory_space<vmem>>, vector<32x64xbf16>
      %c0_57 = arith.constant 0 : index
      %c0_58 = arith.constant 0 : index
      %140 = vector.load %arg13[%c0_57, %c0_58] : memref<1x64xf32, #tpu.memory_space<vmem>>, vector<1x64xf32>
      %c0_59 = arith.constant 0 : index
      %c0_60 = arith.constant 0 : index
      %141 = vector.load %arg14[%c0_59, %c0_60] : memref<64x4xbf16, #tpu.memory_space<vmem>>, vector<64x4xbf16>
      %c0_61 = arith.constant 0 : index
      %c0_62 = arith.constant 0 : index
      %142 = vector.load %arg15[%c0_61, %c0_62] : memref<1x4xf32, #tpu.memory_space<vmem>>, vector<1x4xf32>
      %cst_63 = arith.constant dense<0.000000e+00> : vector<2xf32>
      %143 = vector.multi_reduction <add>, %135, %cst_63 [1] : vector<2x32xf32> to vector<2xf32>
      %144 = vector.shape_cast %143 : vector<2xf32> to vector<2x1xf32>
      %cst_64 = arith.constant 3.200000e+01 : f32
      %145 = vector.broadcast %cst_64 : f32 to vector<2x1xf32>
      %146 = arith.divf %144, %145 : vector<2x1xf32>
      %147 = arith.mulf %135, %135 : vector<2x32xf32>
      %cst_65 = arith.constant dense<0.000000e+00> : vector<2xf32>
      %148 = vector.multi_reduction <add>, %147, %cst_65 [1] : vector<2x32xf32> to vector<2xf32>
      %149 = vector.shape_cast %148 : vector<2xf32> to vector<2x1xf32>
      %cst_66 = arith.constant 3.200000e+01 : f32
      %150 = vector.broadcast %cst_66 : f32 to vector<2x1xf32>
      %151 = arith.divf %149, %150 : vector<2x1xf32>
      %152 = arith.mulf %146, %146 : vector<2x1xf32>
      %153 = arith.subf %151, %152 : vector<2x1xf32>
      %154 = vector.broadcast %146 : vector<2x1xf32> to vector<2x32xf32>
      %155 = arith.subf %135, %154 : vector<2x32xf32>
      %cst_67 = arith.constant 9.99999974E-6 : f32
      %156 = vector.broadcast %cst_67 : f32 to vector<2x1xf32>
      %157 = arith.addf %153, %156 : vector<2x1xf32>
      %158 = math.rsqrt %157 : vector<2x1xf32>
      %159 = vector.broadcast %158 : vector<2x1xf32> to vector<2x32xf32>
      %160 = arith.mulf %155, %159 : vector<2x32xf32>
      %161 = vector.broadcast %137 : vector<1x32xf32> to vector<2x32xf32>
      %162 = arith.mulf %160, %161 : vector<2x32xf32>
      %163 = vector.broadcast %138 : vector<1x32xf32> to vector<2x32xf32>
      %164 = arith.addf %162, %163 : vector<2x32xf32>
      %165 = arith.truncf %164 : vector<2x32xf32> to vector<2x32xbf16>
      %cst_68 = arith.constant dense<0.000000e+00> : vector<2x64xf32>
      %166 = tpu.matmul %165, %139, %cst_68 {dimension_numbers = #tpu.dot_dimension_numbers<[1], [0], [0], [1], [0, 0, 1, 1], [], []>} : vector<2x32xbf16>, vector<32x64xbf16>, vector<2x64xf32> -> vector<2x64xf32>
      %167 = vector.broadcast %140 : vector<1x64xf32> to vector<2x64xf32>
      %168 = arith.addf %166, %167 : vector<2x64xf32>
      %cst_69 = arith.constant 0.000000e+00 : f32
      %169 = vector.broadcast %cst_69 : f32 to vector<2x64xf32>
      %170 = arith.maximumf %168, %169 : vector<2x64xf32>
      %171 = arith.truncf %170 : vector<2x64xf32> to vector<2x64xbf16>
      %cst_70 = arith.constant dense<0.000000e+00> : vector<2x4xf32>
      %172 = tpu.matmul %171, %141, %cst_70 {dimension_numbers = #tpu.dot_dimension_numbers<[1], [0], [0], [1], [0, 0, 1, 1], [], []>} : vector<2x64xbf16>, vector<64x4xbf16>, vector<2x4xf32> -> vector<2x4xf32>
      %173 = vector.broadcast %142 : vector<1x4xf32> to vector<2x4xf32>
      %174 = arith.addf %172, %173 : vector<2x4xf32>
      %c0_71 = arith.constant 0 : index
      %c0_72 = arith.constant 0 : index
      %c0_73 = arith.constant 0 : index
      %175 = vector.load %arg16[%c0_71, %c0_72, %c0_73] : memref<1x2x4xf32, #tpu.memory_space<vmem>>, vector<1x2x4xf32>
      %176 = vector.shape_cast %175 : vector<1x2x4xf32> to vector<2x4xf32>
      %177 = vector.shape_cast %174 : vector<2x4xf32> to vector<1x2x4xf32>
      tpu.vector_store %arg16[%c0_71, %c0_72, %c0_73], %177 {strides = array<i32>} : memref<1x2x4xf32, #tpu.memory_space<vmem>>, vector<1x2x4xf32>,
    } else {
    }
    return
  }
  func.func @transform_0(%arg0: i32, %arg1: i32) -> (i32, i32, i32) {
    %c0_i32 = arith.constant 0 : i32
    %c0_i32_0 = arith.constant 0 : i32
    %c0_i32_1 = arith.constant 0 : i32
    return %arg0, %c0_i32, %c0_i32_0 : i32, i32, i32
  }
  func.func @transform_1(%arg0: i32, %arg1: i32) -> (i32, i32) {
    %c0_i32 = arith.constant 0 : i32
    %c0_i32_0 = arith.constant 0 : i32
    %c0_i32_1 = arith.constant 0 : i32
    return %c0_i32, %c0_i32_0 : i32, i32
  }
  func.func @transform_2(%arg0: i32, %arg1: i32) -> (i32, i32) {
    %c0_i32 = arith.constant 0 : i32
    %c0_i32_0 = arith.constant 0 : i32
    %c0_i32_1 = arith.constant 0 : i32
    return %c0_i32, %c0_i32_0 : i32, i32
  }
  func.func @transform_3(%arg0: i32, %arg1: i32) -> (i32, i32) {
    %c0_i32 = arith.constant 0 : i32
    %c0_i32_0 = arith.constant 0 : i32
    %c0_i32_1 = arith.constant 0 : i32
    return %c0_i32, %c0_i32_0 : i32, i32
  }
  func.func @transform_4(%arg0: i32, %arg1: i32) -> (i32, i32) {
    %c0_i32 = arith.constant 0 : i32
    %c0_i32_0 = arith.constant 0 : i32
    %c0_i32_1 = arith.constant 0 : i32
    return %c0_i32, %c0_i32_0 : i32, i32
  }
  func.func @transform_5(%arg0: i32, %arg1: i32) -> (i32, i32, i32) {
    %c0_i32 = arith.constant 0 : i32
    %c0_i32_0 = arith.constant 0 : i32
    %c0_i32_1 = arith.constant 0 : i32
    return %arg1, %c0_i32, %c0_i32_0 : i32, i32, i32
  }
  func.func @transform_6(%arg0: i32, %arg1: i32) -> (i32, i32, i32) {
    %c0_i32 = arith.constant 0 : i32
    %c0_i32_0 = arith.constant 0 : i32
    %c0_i32_1 = arith.constant 0 : i32
    return %arg1, %c0_i32, %c0_i32_0 : i32, i32, i32
  }
  func.func @transform_7(%arg0: i32, %arg1: i32) -> (i32, i32, i32) {
    %c0_i32 = arith.constant 0 : i32
    %c0_i32_0 = arith.constant 0 : i32
    %c0_i32_1 = arith.constant 0 : i32
    return %arg1, %c0_i32, %c0_i32_0 : i32, i32, i32
  }
  func.func @transform_8(%arg0: i32, %arg1: i32) -> (i32, i32, i32) {
    %c0_i32 = arith.constant 0 : i32
    %c0_i32_0 = arith.constant 0 : i32
    %c0_i32_1 = arith.constant 0 : i32
    return %arg1, %c0_i32, %c0_i32_0 : i32, i32, i32
  }
  func.func @transform_9(%arg0: i32, %arg1: i32) -> (i32, i32) {
    %c0_i32 = arith.constant 0 : i32
    %c0_i32_0 = arith.constant 0 : i32
    %c0_i32_1 = arith.constant 0 : i32
    return %c0_i32, %c0_i32_0 : i32, i32
  }
  func.func @transform_10(%arg0: i32, %arg1: i32) -> (i32, i32) {
    %c0_i32 = arith.constant 0 : i32
    %c0_i32_0 = arith.constant 0 : i32
    %c0_i32_1 = arith.constant 0 : i32
    return %c0_i32, %c0_i32_0 : i32, i32
  }
  func.func @transform_11(%arg0: i32, %arg1: i32) -> (i32, i32) {
    %c0_i32 = arith.constant 0 : i32
    %c0_i32_0 = arith.constant 0 : i32
    %c0_i32_1 = arith.constant 0 : i32
    return %c0_i32, %c0_i32_0 : i32, i32
  }
  func.func @transform_12(%arg0: i32, %arg1: i32) -> (i32, i32) {
    %c0_i32 = arith.constant 0 : i32
    %c0_i32_0 = arith.constant 0 : i32
    %c0_i32_1 = arith.constant 0 : i32
    return %c0_i32, %c0_i32_0 : i32, i32
  }
  func.func @transform_13(%arg0: i32, %arg1: i32) -> (i32, i32) {
    %c0_i32 = arith.constant 0 : i32
    %c0_i32_0 = arith.constant 0 : i32
    %c0_i32_1 = arith.constant 0 : i32
    return %c0_i32, %c0_i32_0 : i32, i32
  }
  func.func @transform_14(%arg0: i32, %arg1: i32) -> (i32, i32, i32) {
    %c0_i32 = arith.constant 0 : i32
    %c0_i32_0 = arith.constant 0 : i32
    %c0_i32_1 = arith.constant 0 : i32
    return %arg0, %c0_i32, %c0_i32_0 : i32, i32, i32
  }
}

</mosaic_0001>

<bundles_post_ra>
// kernel: fnet_classifier_forward.1
= control target key start
LH: loop header
LB: loop body
LE: loop exit
PB: predicated region body
PF: predicated region fallthrough
CT: control target
= control target key end

     0   :  { %s2070_s0 = inlined_call_operand.vmem [shape: bf16[1,16,32], index: 0, kind: input, shape index: {}]   ;;  %s2071_s1 = inlined_call_operand.vmem [shape: bf16[32,32], index: 1, kind: input, shape index: {}]   ;;  %s2072_s2 = inlined_call_operand.vmem [shape: bf16[32,32], index: 2, kind: input, shape index: {}]   ;;  %s2073_s3 = inlined_call_operand.vmem [shape: bf16[8,8], index: 3, kind: input, shape index: {}]   ;;  %s2074_s4 = inlined_call_operand.vmem [shape: bf16[8,8], index: 4, kind: input, shape index: {}]   ;;  %s2075_s5 = inlined_call_operand.vmem [shape: f32[2,8,32], index: 5, kind: input, shape index: {}]   ;;  %s2076_s6 = inlined_call_operand.vmem [shape: bf16[2,32,64], index: 6, kind: input, shape index: {}]   ;;  %s2077_s7 = inlined_call_operand.vmem [shape: f32[2,1,64], index: 7, kind: input, shape index: {}]   ;;  %s2078_s8 = inlined_call_operand.vmem [shape: bf16[2,64,32], index: 8, kind: input, shape index: {}]   ;;  %s2079_s9 = inlined_call_operand.vmem [shape: f32[2,32], index: 9, kind: input, shape index: {}]   ;;  %s2080_s10 = inlined_call_operand.vmem [shape: bf16[32,64], index: 10, kind: input, shape index: {}]   ;;  %s2081_s11 = inlined_call_operand.vmem [shape: f32[1,64], index: 11, kind: input, shape index: {}]   ;;  %s2082_s12 = inlined_call_operand.vmem [shape: bf16[64,4], index: 12, kind: input, shape index: {}]   ;;  %s2083_s13 = inlined_call_operand.vmem [shape: f32[1,4], index: 13, kind: input, shape index: {}]   ;;  %s2084_s14 = inlined_call_operand.hbm [shape: f32[1,2,4], index: 14, kind: output, shape index: {}]  }
   0x1   :  { %2087 = sst [smem:[#allocation9_spill]] %s2084_s14 }
   0x2   :  { %19 = vsyncpa [#allocation4], 0  ;;  %s1823_s29 = smov 0   ;;  %s1825_s30 = smov 0  }
   0x3   :  { %s1827_s15 = smov 0  }
   0x4 LB: > { %2088 = sst [smem:[#allocation6_spill]] %s1737_s30  ;;  %s34_s17 = sadd.s32 1, %s1737_s30  ;;  %s1741_s15 = sphi %s1827_s15, %s25_s15   ;;  %s1737_s30 = sphi %s1825_s30, %s2097_s30   ;;  %s1733_s29 = sphi %s1823_s29, %s2096_s29  }
   0x5   : > { %2089 = sst [smem:[#allocation7_spill]] %s1741_s15  ;;  %p35_p0 = scmp.ge.s32.totalorder %s34_s17, 2 }
   0x6   : > { %p1465_p1 = scmp.ge.s32.totalorder %s1741_s15, 1  ;;  %p462_p2 = scmp.lt.s32.totalorder %s1741_s15, 3 }
   0x7   : > { %s2099_s17 = smov (%p35_p0, %s34_s17), 0 }
   0x8   : > { %2090 = sst [smem:[#allocation8_spill]] %s2099_s17  ;;  %p463_p3 = pnand %p1465_p1, %p462_p2 }
   0x9   : > { %p525_p4 = scmp.lt.s32.totalorder (!%p463_p3), %s1733_s29, 1  ;;  %p1471_p5 = scmp.ne.s32.totalorder (!%p463_p3), %s1733_s29, 0 }
   0xa   : > { %466 = sbr.rel (%p463_p3) target bundleno = 1985 (0x7c1), region = 76 }
   0xf   : > { %s1846_s18 = scalar_select %p525_p4, %s1733_s29, 1 }
  0x10   : > { %546 = sbr.rel (%p1471_p5) target bundleno = 25 (0x19), region = 80 }
  0x11   : > { %s1466_s19 = sshll.u32 %s1846_s18, 3  ;;  %s1506_s20 = sshll.u32 %s1846_s18, 4 }
  0x12   : > { %s1853_s23 = scalar_lea.vmem %s2075_s5, %s1466_s19  ;;  %s1858_s26 = scalar_lea.vmem %s2076_s6, %s1506_s20 }
  0x13   : > { %s536_s16 = scalar_lea.vmem %s2077_s7, %s1846_s18  ;;  %s1507_s17 = sshll.u32 %s1846_s18, 5 }
  0x14   : > { %s1868_s15 = scalar_lea.vmem %s2078_s8, %s1507_s17 }
  0x15   : > { %v1509_v0 = vld [vmem:[%s2070_s0] sm:$0xff]   ;;  %vm551_vm0 = vcmask 261120  }
  0x16   : > { %v1510_v1 = vunpack.c.l.bf16 %v1509_v0  ;;  %v1511_v2 = vunpack.c.h.bf16 %v1509_v0 }
  0x18   : > { %552 = vst.msk [vmem:[#allocation2] sm:$0xff] %vm551_vm0, %v1510_v1  ;;  %553 = vst.msk [vmem:[#allocation2 + $0x8] sm:$0xff] %vm551_vm0, %v1511_v2 }
  0x19 PF: > { %vm580_vm1 = vcmask 261120   ;;  %v1657_v11 = vld [vmem:[%s2071_s1 + $0x8] sm:$0xff]   ;;  %v1743_v13 = vmov 0.0   ;;  %v1659_v14 = vld [vmem:[%s2071_s1] sm:$0xff]   ;;  %vm1744_vm2 = vmmov 0   ;;  %v612_v30 = vlaneseq  ;;  %p1491_p6 = scmp.ne.s32.totalorder %s1733_s29, 1 }
  0x1a   : > { %v1658_v12 = vld [vmem:[%s2072_s2 + $0x8] sm:$0xff]   ;;  %1542 = vmatprep.subr.bf16.mxu0 %v1743_v13  ;;  %1550 = vmatprep.subr.bf16.mxu1 %v1743_v13  ;;  %v1660_v15 = vld [vmem:[%s2072_s2] sm:$0xff]   ;;  %vm739_vm3 = vcmask 1043456   ;;  %vm735_vm4 = vcmask 64512   ;;  %vm1114_vm5 = vcmask 523264  }
  0x1b   : > { %1543 = vmatpush3.bf16.msra.mxu0 %v1657_v11  ;;  %1551 = vmatpush3.bf16.msra.mxu1 %v1658_v12  ;;  %v1910_v31 = vshrl.u32 %v612_v30, 7  ;;  %v1914_v33 = vld [vmem:[%s1853_s23] sm:$0xff] }
  0x1c   : > { %1544 = vmatprep.subr.bf16.mxu0 %v1743_v13  ;;  %1552 = vmatprep.subr.bf16.mxu1 %v1743_v13  ;;  %v564_v58 = vld [vmem:[%s2073_s3] sm:$0xf] }
  0x1d   : > { %1546 = vmatprep.mubr.msk.bf16.mxu0 %vm1744_vm2, %v1743_v13  ;;  %1554 = vmatprep.mubr.msk.bf16.mxu1 %vm1744_vm2, %v1743_v13  ;;  %v614_v32 = vsub.s32 0, %v1910_v31  ;;  %v620_v38 = vsub.s32 1, %v1910_v31  ;;  %v565_v59 = vld [vmem:[%s2074_s4] sm:$0xf] }
  0x1f   : > { %v1874_v3 = vld [vmem:[#allocation2] sm:$0xff]  ;;  %v1876_v4 = vld [vmem:[#allocation2 + $0x8] sm:$0xff]  ;;  %1545 = vmatpush3.bf16.msra.mxu0 %v1659_v14  ;;  %1553 = vmatpush3.bf16.msra.mxu1 %v1660_v15  ;;  %v615_v37 = vrot.slane %v1914_v33, %v614_v32  ;;  %v621_v43 = vrot.slane %v1914_v33, %v620_v38 }
  0x20   : > { %v581_v5 = vsel %vm580_vm1, %v1874_v3, 0.0  ;;  %v590_v6 = vmul.f32 %v1874_v3, %v1874_v3  ;;  %v584_v7 = vsel %vm580_vm1, %v1876_v4, 0.0  ;;  %v591_v8 = vmul.f32 %v1876_v4, %v1876_v4  ;;  %1558 = vmatprep.subr.bf16.mxu0 %v1743_v13  ;;  %1564 = vmatprep.subr.bf16.mxu1 %v1743_v13 }
  0x21   : > { %582 = vadd.xlane.f32.xlu0 %v581_v5 }
  0x22   : > { %v592_v9 = vsel %vm580_vm1, %v590_v6, 0.0  ;;  %v595_v10 = vsel %vm580_vm1, %v591_v8, 0.0 }
  0x23   : > { %593 = vadd.xlane.f32.xlu1 %v592_v9 }
  0x25   : > { %585 = vadd.xlane.f32.xlu0 %v584_v7 }
  0x27   : > { %596 = vadd.xlane.f32.xlu1 %v595_v10 }
  0xaa   : > { %v583_v16 = vpop.xlane.xlu0 %582 }
  0xab   : > { %v588_v17 = vmul.f32 0.03125, %v583_v16 }
  0xac   : > { %v594_v18 = vpop.xlane.xlu1 %593 }
  0xad   : > { %v600_v19 = vmul.f32 %v588_v17, %v588_v17  ;;  %v598_v20 = vmul.f32 0.03125, %v594_v18  ;;  %v604_v34 = vsub.f32 %v1874_v3, %v588_v17 }
  0xae   : > { %v586_v21 = vpop.xlane.xlu0 %585 }
  0xaf   : > { %v602_v22 = vsub.f32 %v598_v20, %v600_v19  ;;  %v589_v23 = vmul.f32 0.03125, %v586_v21 }
  0xb0   : > { %v597_v24 = vpop.xlane.xlu1 %596 }
  0xb1   : > { %v606_v25 = vadd.f32 1e-05, %v602_v22  ;;  %v601_v26 = vmul.f32 %v589_v23, %v589_v23  ;;  %v599_v27 = vmul.f32 0.03125, %v597_v24  ;;  %v605_v39 = vsub.f32 %v1876_v4, %v589_v23 }
  0xb3   : > { %1667 = vrsqrt.f32 %v606_v25  ;;  %v603_v28 = vsub.f32 %v599_v27, %v601_v26 }
  0xb5   : > { %v607_v29 = vadd.f32 1e-05, %v603_v28 }
  0xb7   : > { %1669 = vrsqrt.f32 %v607_v29 }
  0xc0   : > { %v1668_v35 = vpop.eup %1667 }
  0xc1   : > { %v610_v36 = vmul.f32 %v1668_v35, %v604_v34 }
  0xc3   : > { %v616_v42 = vmul.f32 %v615_v37, %v610_v36 }
  0xc4   : > { %v1670_v40 = vpop.eup %1669 }
  0xc5   : > { %v611_v41 = vmul.f32 %v1670_v40, %v605_v39  ;;  %v622_v45 = vadd.f32 %v621_v43, %v616_v42 }
  0xc7   : > { %v617_v44 = vmul.f32 %v615_v37, %v611_v41 }
  0xc9   : > { %v623_v46 = vadd.f32 %v621_v43, %v617_v44 }
  0xcb   : > { %v624_v47 = vpack.c.bf16 %v623_v46, %v622_v45 }
  0xcd   : > { %1547 = vmatmul.mubr.msk.bf16.vlgmr.msra.gmra.mxu0 %vm580_vm1, %v624_v47  ;;  %1555 = vmatmul.mubr.msk.bf16.vlgmr.msra.gmra.mxu1 %vm580_vm1, %v624_v47 }
  0xce   : > { %1560 = vmatprep.mubr.msk.bf16.mxu0 %vm1744_vm2, %v1743_v13  ;;  %1566 = vmatprep.mubr.msk.bf16.mxu1 %vm1744_vm2, %v1743_v13 }
 0x18d   : > { %v674_v48 = vpop.f32.mrf.mxu0  ;;  %v727_v49 = vpop.f32.mrf.mxu1 }
 0x18e   : > { %v734_v50 = vpack.c.bf16 %v674_v48, %v674_v48  ;;  %v783_v51 = vpack.c.bf16 %v727_v49, %v727_v49  ;;  %v954_v49 = vsub.s32 2, %v1910_v31 }
 0x18f   : > { %v1548_v52 = vpop.f32.mrf.mxu0  ;;  %v1556_v53 = vpop.f32.mrf.mxu1 }
 0x190   : > { %v741_v54 = vsel %vm739_vm3, %v734_v50, 0  ;;  %v788_v55 = vsel %vm739_vm3, %v783_v51, 0  ;;  %v960_v50 = vsub.s32 3, %v1910_v31  ;;  %v955_v52 = vrot.slane %v1914_v33, %v954_v49 }
 0x191   : > { %v677_v56 = vpop.f32.mrf.mxu0  ;;  %v730_v57 = vpop.f32.mrf.mxu1  ;;  %1559 = vmatpush3.bf16.msra.mxu0 %v741_v54  ;;  %1565 = vmatpush3.bf16.msra.mxu1 %v788_v55 }
 0x192   : > { %v831_v60 = vpack.c.bf16 %v677_v56, %v677_v56  ;;  %v875_v61 = vpack.c.bf16 %v730_v57, %v730_v57  ;;  %1570 = vmatprep.subr.bf16.mxu0 %v1743_v13  ;;  %1576 = vmatprep.subr.bf16.mxu1 %v1743_v13  ;;  %v961_v55 = vrot.slane %v1914_v33, %v960_v50 }
 0x193   : > { %v1549_v62 = vpop.f32.mrf.mxu0  ;;  %v1557_v63 = vpop.f32.mrf.mxu1 }
 0x194   : > { %v833_v0 = vsel %vm739_vm3, %v831_v60, 0  ;;  %v877_v1 = vsel %vm739_vm3, %v875_v61, 0  ;;  %1561 = vmatmul.mubr.msk.bf16.vlgmr.msra.gmra.mxu0 %vm735_vm4, %v564_v58  ;;  %1567 = vmatmul.mubr.msk.bf16.vlgmr.msra.gmra.mxu1 %vm735_vm4, %v565_v59 }
 0x195   : > { %1571 = vmatpush3.bf16.msra.mxu0 %v833_v0  ;;  %1577 = vmatpush3.bf16.msra.mxu1 %v877_v1 }
 0x196   : > { %1572 = vmatprep.mubr.msk.bf16.mxu0 %vm1744_vm2, %v1743_v13  ;;  %1578 = vmatprep.mubr.msk.bf16.mxu1 %vm1744_vm2, %v1743_v13 }
 0x197   : > { %1582 = vmatprep.subr.bf16.mxu0 %v1743_v13  ;;  %1590 = vmatprep.subr.bf16.mxu1 %v1743_v13 }
 0x19c   : > { %1573 = vmatmul.mubr.msk.bf16.vlgmr.msra.gmra.mxu0 %vm735_vm4, %v564_v58  ;;  %1579 = vmatmul.mubr.msk.bf16.vlgmr.msra.gmra.mxu1 %vm735_vm4, %v565_v59 }
 0x19d   : > { %1586 = vmatprep.mubr.msk.bf16.mxu0 %vm1744_vm2, %v1743_v13  ;;  %1598 = vmatprep.mubr.msk.bf16.mxu1 %vm1744_vm2, %v1743_v13 }
 0x254   : > { %v777_v2 = vpop.f32.mrf.mxu0  ;;  %v824_v5 = vpop.f32.mrf.mxu1 }
 0x255   : > { %v830_v6 = vsub.f32 %v777_v2, %v824_v5 }
 0x256   : > { %v1562_v7 = vpop.f32.mrf.mxu0  ;;  %v1568_v8 = vpop.f32.mrf.mxu1 }
 0x257   : > { %v920_v9 = vadd.f32 %v830_v6, %v622_v45  ;;  %v1661_v8 = vld [vmem:[%s1858_s26 + $0x8] sm:$0xff]  }
 0x258   : > { %v780_v10 = vpop.f32.mrf.mxu0  ;;  %v827_v11 = vpop.f32.mrf.mxu1  ;;  %1583 = vmatpush3.bf16.msra.mxu0 %v1661_v8 }
 0x259   : > { %v922_v12 = vsel %vm580_vm1, %v920_v9, 0.0  ;;  %v930_v14 = vmul.f32 %v920_v9, %v920_v9  ;;  %1584 = vmatprep.subr.bf16.mxu0 %v1743_v13 }
 0x25a   : > { %v1569_v15 = vpop.f32.mrf.mxu1  ;;  %923 = vadd.xlane.f32.xlu0 %v922_v12  ;;  %v1563_v16 = vpop.f32.mrf.mxu0 }
 0x25b   : > { %v932_v20 = vsel %vm580_vm1, %v930_v14, 0.0 }
 0x25c   : > { %v869_v17 = vpop.f32.mrf.mxu0  ;;  %v913_v18 = vpop.f32.mrf.mxu1 }
 0x25d   : > { %v919_v19 = vsub.f32 %v869_v17, %v913_v18 }
 0x25e   : > { %v1580_v21 = vpop.f32.mrf.mxu1  ;;  %933 = vadd.xlane.f32.xlu0 %v932_v20  ;;  %v1574_v22 = vpop.f32.mrf.mxu0 }
 0x25f   : > { %v921_v23 = vadd.f32 %v919_v19, %v623_v46 }
 0x260   : > { %v872_v24 = vpop.f32.mrf.mxu0  ;;  %v916_v25 = vpop.f32.mrf.mxu1 }
 0x261   : > { %v925_v26 = vsel %vm580_vm1, %v921_v23, 0.0  ;;  %v931_v27 = vmul.f32 %v921_v23, %v921_v23  ;;  %v998_v24 = vsub.s32 4, %v1910_v31 }
 0x262   : > { %v1581_v28 = vpop.f32.mrf.mxu1  ;;  %926 = vadd.xlane.f32.xlu1 %v925_v26  ;;  %v1575_v29 = vpop.f32.mrf.mxu0 }
 0x263   : > { %v935_v30 = vsel %vm580_vm1, %v931_v27, 0.0  ;;  %v999_v28 = vrot.slane %v1914_v33, %v998_v24  ;;  %v1004_v29 = vsub.s32 5, %v1910_v31 }
 0x266   : > { %936 = vadd.xlane.f32.xlu1 %v935_v30 }
 0x2e3   : > { %v924_v34 = vpop.xlane.xlu0 %923 }
 0x2e4   : > { %v928_v35 = vmul.f32 0.03125, %v924_v34 }
 0x2e6   : > { %v940_v37 = vmul.f32 %v928_v35, %v928_v35  ;;  %v944_v51 = vsub.f32 %v920_v9, %v928_v35  ;;  %v1662_v9 = vld [vmem:[%s1858_s26] sm:$0xff]  }
 0x2e7   : > { %v934_v36 = vpop.xlane.xlu0 %933  ;;  %1585 = vmatpush3.bf16.msra.mxu0 %v1662_v9 }
 0x2e8   : > { %v938_v39 = vmul.f32 0.03125, %v934_v36 }
 0x2ea   : > { %v942_v40 = vsub.f32 %v938_v39, %v940_v37  ;;  %v1005_v37 = vrot.slane %v1914_v33, %v1004_v29 }
 0x2eb   : > { %v927_v41 = vpop.xlane.xlu1 %926 }
 0x2ec   : > { %v946_v42 = vadd.f32 1e-05, %v942_v40  ;;  %v929_v43 = vmul.f32 0.03125, %v927_v41 }
 0x2ee   : > { %1671 = vrsqrt.f32 %v946_v42  ;;  %v941_v45 = vmul.f32 %v929_v43, %v929_v43  ;;  %v945_v58 = vsub.f32 %v921_v23, %v929_v43  ;;  %v1663_v43 = vld [vmem:[%s1868_s15 + $0x18] sm:$0xff]  }
 0x2ef   : > { %v937_v44 = vpop.xlane.xlu1 %936  ;;  %1591 = vmatpush3.bf16.msra.mxu1 %v1663_v43 }
 0x2f0   : > { %v939_v46 = vmul.f32 0.03125, %v937_v44  ;;  %1592 = vmatprep.subr.bf16.mxu1 %v1743_v13  ;;  %v1664_v44 = vld [vmem:[%s1868_s15 + $0x10] sm:$0xff]  }
 0x2f2   : > { %v943_v47 = vsub.f32 %v939_v46, %v941_v45  ;;  %v1665_v45 = vld [vmem:[%s1868_s15 + $0x8] sm:$0xff]   ;;  %v1666_v46 = vld [vmem:[%s1868_s15] sm:$0xff]  }
 0x2f3   : > { %1593 = vmatpush3.bf16.msra.mxu1 %v1664_v44 }
 0x2f4   : > { %v947_v48 = vadd.f32 1e-05, %v943_v47  ;;  %1594 = vmatprep.subr.bf16.mxu1 %v1743_v13  ;;  %v1482_v47 = vld [vmem:[%s536_s16] ss:$0 sm:$0xff] }
 0x2f6   : > { %1673 = vrsqrt.f32 %v947_v48 }
 0x2f7   : > { %1595 = vmatpush3.bf16.msra.mxu1 %v1665_v45 }
 0x2f8   : > { %1596 = vmatprep.subr.bf16.mxu1 %v1743_v13 }
 0x2fb   : > { %v1672_v53 = vpop.eup %1671  ;;  %1597 = vmatpush3.bf16.msra.mxu1 %v1666_v46 }
 0x2fc   : > { %v950_v54 = vmul.f32 %v1672_v53, %v944_v51 }
 0x2fe   : > { %v956_v56 = vmul.f32 %v955_v52, %v950_v54 }
 0x300   : > { %v962_v57 = vadd.f32 %v961_v55, %v956_v56 }
 0x302   : > { %v1966_v59 = vadd.f32 %v962_v57, %v1874_v3 }
 0x303   : > { %v1674_v60 = vpop.eup %1673 }
 0x304   : > { %v966_v61 = vsel %vm580_vm1, %v1966_v59, 0.0  ;;  %v974_v62 = vmul.f32 %v1966_v59, %v1966_v59  ;;  %v951_v63 = vmul.f32 %v1674_v60, %v945_v58 }
 0x305   : > { %967 = vadd.xlane.f32.xlu0 %v966_v61 }
 0x306   : > { %v957_v0 = vmul.f32 %v955_v52, %v951_v63  ;;  %v976_v1 = vsel %vm580_vm1, %v974_v62, 0.0 }
 0x308   : > { %v963_v2 = vadd.f32 %v961_v55, %v957_v0 }
 0x309   : > { %977 = vadd.xlane.f32.xlu0 %v976_v1 }
 0x30a   : > { %v1974_v5 = vadd.f32 %v963_v2, %v1876_v4 }
 0x30c   : > { %v969_v3 = vsel %vm580_vm1, %v1974_v5, 0.0  ;;  %v975_v6 = vmul.f32 %v1974_v5, %v1974_v5 }
 0x30d   : > { %970 = vadd.xlane.f32.xlu1 %v969_v3 }
 0x30e   : > { %v979_v7 = vsel %vm580_vm1, %v975_v6, 0.0 }
 0x311   : > { %980 = vadd.xlane.f32.xlu1 %v979_v7 }
 0x38e   : > { %v968_v10 = vpop.xlane.xlu0 %967 }
 0x38f   : > { %v972_v11 = vmul.f32 0.03125, %v968_v10 }
 0x391   : > { %v984_v12 = vmul.f32 %v972_v11, %v972_v11  ;;  %v988_v26 = vsub.f32 %v1966_v59, %v972_v11  ;;  %v1163_v11 = vsub.s32 6, %v1910_v31 }
 0x392   : > { %v978_v4 = vpop.xlane.xlu0 %977 }
 0x393   : > { %v982_v14 = vmul.f32 0.03125, %v978_v4  ;;  %v1164_v4 = vrot.slane %v1914_v33, %v1163_v11 }
 0x395   : > { %v986_v15 = vsub.f32 %v982_v14, %v984_v12 }
 0x396   : > { %v971_v16 = vpop.xlane.xlu1 %970 }
 0x397   : > { %v990_v17 = vadd.f32 1e-05, %v986_v15  ;;  %v973_v18 = vmul.f32 0.03125, %v971_v16 }
 0x399   : > { %1675 = vrsqrt.f32 %v990_v17  ;;  %v985_v20 = vmul.f32 %v973_v18, %v973_v18  ;;  %v989_v30 = vsub.f32 %v1974_v5, %v973_v18 }
 0x39a   : > { %v981_v19 = vpop.xlane.xlu1 %980 }
 0x39b   : > { %v983_v21 = vmul.f32 0.03125, %v981_v19 }
 0x39d   : > { %v987_v22 = vsub.f32 %v983_v21, %v985_v20 }
 0x39f   : > { %v991_v23 = vadd.f32 1e-05, %v987_v22 }
 0x3a1   : > { %1677 = vrsqrt.f32 %v991_v23 }
 0x3a6   : > { %v1676_v25 = vpop.eup %1675 }
 0x3a7   : > { %v994_v27 = vmul.f32 %v1676_v25, %v988_v26 }
 0x3a9   : > { %v1000_v36 = vmul.f32 %v999_v28, %v994_v27 }
 0x3ab   : > { %v1006_v40 = vadd.f32 %v1005_v37, %v1000_v36 }
 0x3ae   : > { %v1678_v34 = vpop.eup %1677 }
 0x3af   : > { %v995_v35 = vmul.f32 %v1678_v34, %v989_v30 }
 0x3b1   : > { %v1001_v39 = vmul.f32 %v999_v28, %v995_v35 }
 0x3b3   : > { %v1007_v41 = vadd.f32 %v1005_v37, %v1001_v39 }
 0x3b5   : > { %v1008_v42 = vpack.c.bf16 %v1007_v41, %v1006_v40 }
 0x3b7   : > { %1587 = vmatmul.mubr.msk.bf16.vlgmr.msra.gmra.mxu0 %vm580_vm1, %v1008_v42 }
 0x477   : > { %v1064_v48 = vpop.f32.mrf.mxu0 }
 0x478   : > { %v1065_v49 = vadd.f32 %v1482_v47, %v1064_v48 }
 0x479   : > { %v1588_v50 = vpop.f32.mrf.mxu0 }
 0x47a   : > { %v1071_v51 = vmul.f32 %v1065_v49, %v1065_v49 }
 0x47b   : > { %v1067_v52 = vpop.f32.mrf.mxu0 }
 0x47c   : > { %v1073_v53 = vmul.f32 %v1071_v51, %v1065_v49  ;;  %v1068_v54 = vadd.f32 %v1482_v47, %v1067_v52 }
 0x47d   : > { %v1589_v55 = vpop.f32.mrf.mxu0 }
 0x47e   : > { %v1075_v56 = vmul.f32 0.044715, %v1073_v53  ;;  %v1072_v57 = vmul.f32 %v1068_v54, %v1068_v54 }
 0x480   : > { %v1077_v58 = vadd.f32 %v1075_v56, %v1065_v49  ;;  %v1074_v60 = vmul.f32 %v1072_v57, %v1068_v54 }
 0x482   : > { %v1079_v13 = vmul.f32 0.7978846, %v1077_v58  ;;  %v1076_v61 = vmul.f32 0.044715, %v1074_v60 }
 0x484   : > { %1679 = vtanh.f32 %v1079_v13  ;;  %v1078_v62 = vadd.f32 %v1076_v61, %v1068_v54 }
 0x486   : > { %v1080_v63 = vmul.f32 0.7978846, %v1078_v62 }
 0x488   : > { %1681 = vtanh.f32 %v1080_v63 }
 0x491   : > { %v1680_v0 = vpop.eup %1679 }
 0x492   : > { %v1083_v1 = vadd.f32 1.0, %v1680_v0 }
 0x494   : > { %v1085_v3 = vmul.f32 0.5, %v1083_v1 }
 0x495   : > { %v1682_v2 = vpop.eup %1681 }
 0x496   : > { %v1084_v6 = vadd.f32 1.0, %v1682_v2  ;;  %v1087_v8 = vmul.f32 %v1085_v3, %v1065_v49 }
 0x498   : > { %v1086_v7 = vmul.f32 0.5, %v1084_v6 }
 0x49a   : > { %v1088_v9 = vmul.f32 %v1086_v7, %v1068_v54 }
 0x49c   : > { %v1089_v10 = vpack.c.bf16 %v1088_v9, %v1087_v8 }
 0x49e   : > { %1599 = vmatmul.mubr.msk.bf16.vlgmr.msra.gmra.mxu1 %vm1114_vm5, %v1089_v10 }
 0x55e   : > { %v1152_v12 = vpop.f32.mrf.mxu1 }
 0x55f   : > { %v1159_v14 = vadd.f32 %v1152_v12, %v1966_v59 }
 0x560   : > { %v1600_v15 = vpop.f32.mrf.mxu1 }
 0x561   : > { %v1165_v16 = vadd.f32 %v1164_v4, %v1159_v14 }
 0x562   : > { %v1155_v17 = vpop.f32.mrf.mxu1 }
 0x563   : > { %1167 = vst.msk [vmem:[#allocation2] sm:$0xff] %vm580_vm1, %v1165_v16  ;;  %v1160_v18 = vadd.f32 %v1155_v17, %v1974_v5  ;;  %1172 = sbr.rel (%p1491_p6) target bundleno = 1960 (0x7a8), region = 84 }
 0x564   : > { %v1601_v19 = vpop.f32.mrf.mxu1 }
 0x565   : > { %v1166_v20 = vadd.f32 %v1164_v4, %v1160_v18 }
 0x567   : > { %1168 = vst.msk [vmem:[#allocation2 + $0x8] sm:$0xff] %vm580_vm1, %v1166_v20 }
 0x568   : > { %vm1189_vm6 = vcmask 254976   ;;  %v1683_v23 = vld [vmem:[%s2080_s10 + $0x8] sm:$0xff]   ;;  %v1745_v24 = vmov 0.0   ;;  %vm1746_vm7 = vmmov 0   ;;  %v1684_v5 = vld [vmem:[%s2080_s10] sm:$0xff]   ;;  %v1685_v25 = vld [vmem:[%s2082_s12 + $0x18] sm:$0xff]  }
 0x569   : > { %1602 = vmatprep.subr.bf16.mxu0 %v1745_v24  ;;  %1606 = vmatprep.mubr.msk.bf16.mxu0 %vm1746_vm7, %v1745_v24  ;;  %v1686_v26 = vld [vmem:[%s2082_s12 + $0x10] sm:$0xff]   ;;  %v1174_v37 = vld [vmem:[%s2079_s9] sm:$0x3]  ;;  %v1687_v47 = vld [vmem:[%s2082_s12 + $0x8] sm:$0xff]   ;;  %vm1352_vm8 = vcmask 25600  }
 0x56a   : > { %1603 = vmatpush3.bf16.msra.mxu0 %v1683_v23  ;;  %1610 = vmatprep.subr.bf16.mxu1 %v1745_v24  ;;  %v1208_v40 = vrot.slane %v1174_v37, %v614_v32  ;;  %v1213_v43 = vrot.slane %v1174_v37, %v620_v38  ;;  %v1688_v32 = vld [vmem:[%s2082_s12] sm:$0xff]  }
 0x56b   : > { %1604 = vmatprep.subr.bf16.mxu0 %v1745_v24  ;;  %1618 = vmatprep.mubr.msk.bf16.mxu1 %vm1746_vm7, %v1745_v24  ;;  %v1492_v31 = vld [vmem:[%s2081_s11] ss:$0 sm:$0xff] }
 0x56c   : > { %1611 = vmatpush3.bf16.msra.mxu1 %v1685_v25  ;;  %v1496_v54 = vld [vmem:[%s2083_s13] ss:$0 sm:$0xff] }
 0x56d   : > { %1612 = vmatprep.subr.bf16.mxu1 %v1745_v24 }
 0x56e   : > { %v1173_v21 = vld [vmem:[#allocation2] ss:$8 sm:$0x3]  ;;  %1605 = vmatpush3.bf16.msra.mxu0 %v1684_v5 }
 0x56f   : > { %v1190_v33 = vsel %vm1189_vm6, %v1173_v21, 0.0  ;;  %v1194_v22 = vmul.f32 %v1173_v21, %v1173_v21 }
 0x570   : > { %1191 = vadd.xlane.f32.xlu0 %v1190_v33  ;;  %1613 = vmatpush3.bf16.msra.mxu1 %v1686_v26 }
 0x571   : > { %v1195_v59 = vsel %vm1189_vm6, %v1194_v22, 0.0  ;;  %1614 = vmatprep.subr.bf16.mxu1 %v1745_v24 }
 0x574   : > { %1196 = vadd.xlane.f32.xlu0 %v1195_v59  ;;  %1615 = vmatpush3.bf16.msra.mxu1 %v1687_v47 }
 0x575   : > { %1616 = vmatprep.subr.bf16.mxu1 %v1745_v24 }
 0x578   : > { %1617 = vmatpush3.bf16.msra.mxu1 %v1688_v32 }
 0x5f9   : > { %v1192_v27 = vpop.xlane.xlu0 %1191 }
 0x5fa   : > { %v1193_v28 = vmul.f32 0.03125, %v1192_v27 }
 0x5fc   : > { %v1199_v30 = vmul.f32 %v1193_v28, %v1193_v28  ;;  %v1201_v39 = vsub.f32 %v1173_v21, %v1193_v28 }
 0x5fd   : > { %v1197_v29 = vpop.xlane.xlu0 %1196 }
 0x5fe   : > { %v1198_v34 = vmul.f32 0.03125, %v1197_v29 }
 0x600   : > { %v1200_v35 = vsub.f32 %v1198_v34, %v1199_v30 }
 0x602   : > { %v1202_v36 = vadd.f32 1e-05, %v1200_v35 }
 0x604   : > { %1689 = vrsqrt.f32 %v1202_v36 }
 0x611   : > { %v1690_v41 = vpop.eup %1689 }
 0x612   : > { %v1204_v42 = vmul.f32 %v1690_v41, %v1201_v39 }
 0x614   : > { %v1209_v44 = vmul.f32 %v1208_v40, %v1204_v42 }
 0x616   : > { %v1214_v45 = vadd.f32 %v1213_v43, %v1209_v44 }
 0x618   : > { %v1215_v46 = vpack.c.bf16 %v1214_v45, %v1214_v45 }
 0x61a   : > { %1607 = vmatmul.mubr.msk.bf16.vlgmr.msra.gmra.mxu0 %vm580_vm1, %v1215_v46 }
 0x6da   : > { %v1271_v38 = vpop.f32.mrf.mxu0 }
 0x6db   : > { %v1272_v48 = vadd.f32 %v1492_v31, %v1271_v38 }
 0x6dc   : > { %v1608_v49 = vpop.f32.mrf.mxu0 }
 0x6dd   : > { %v1277_v50 = vmax.f32 %v1272_v48, 0.0 }
 0x6de   : > { %v1274_v51 = vpop.f32.mrf.mxu0 }
 0x6df   : > { %v1278_v52 = vpack.c.bf16 %v1277_v50, %v1277_v50 }
 0x6e0   : > { %v1609_v53 = vpop.f32.mrf.mxu0 }
 0x6e1   : > { %1619 = vmatmul.mubr.msk.bf16.vlgmr.msra.gmra.mxu1 %vm1114_vm5, %v1278_v52 }
 0x7a1   : > { %v1346_v55 = vpop.f32.mrf.mxu1 }
 0x7a2   : > { %v1347_v56 = vadd.f32 %v1496_v54, %v1346_v55 }
 0x7a3   : > { %v1620_v57 = vpop.f32.mrf.mxu1 }
 0x7a4   : > { %1353 = vst.msk [vmem:[#allocation3] sm:$0x3] %vm1352_vm8, %v1347_v56 }
 0x7a5   : > { %v1349_v58 = vpop.f32.mrf.mxu1 }
 0x7a7   : > { %v1621_v60 = vpop.f32.mrf.mxu1 }
 0x7a8 PF: > { %s2091_s16 = sld [smem:[#allocation7_spill]]  ;;  %s1747_s29 = smov [#allocation3]  }
 0x7a9   : > { %s1363_s17 = sshll.u32 %s1747_s29, 4  ;;  %s1364_s17 = int_to_ptr.vmem [resolvable:$true] %s1363_s17 }
 0x7aa   : > { %s1691_s20 = scalar_lea.vmem %s1364_s17, 32  ;;  %p1698_p11 = scmp.lt.s32.totalorder %s1364_s17, %s1364_s17 }
 0x7ab   : > { %p1692_p8 = scmp.ne.s32.totalorder %s1364_s17, %s1691_s20  ;;  %p1699_p12 = scmp.lt.s32.totalorder %s1691_s20, %s1691_s20 }
 0x7ad   : > { %p1700_p13 = por %p1699_p12, %p1698_p11 }
 0x7ae   : > { %s2092_s18 = sadd.s32 4294967295, %s2091_s16  }
 0x7af   : > { %p2046_p7 = scmp.eq.s32.totalorder %s2092_s18, 1 }
 0x7b1   : > { %p1693_p9 = pnand %p1692_p8, %p2046_p7 }
 0x7b3   : > { %p1694_p10 = pneg %p1693_p9 }
 0x7b5   : > { %p1701_p0 = pnand %p1700_p13, %p1694_p10 }
 0x7b7   : > { %1704 = shalt.err (!%p1701_p0)
}
 0x7b8   : > { %s2094_s25 = sld [smem:[#allocation9_spill]] }
 0x7be   : > { %1623 = dma.vmem_to_hbm [thread:$0]  (%p2046_p7), %s1364_s17, 32, %s2094_s25, [#allocation4]  }
 0x7bf   : > { %1728 = dma.done.wait (%p2046_p7), [#allocation4], 32  }
 0x7c0   : > { %1730 = vsyncadd (%p2046_p7), [#allocation4], 4294967264 }
 0x7c1 PF: > { %s2095_s27 = sld [smem:[#allocation7_spill]] }
 0x7c2   : > { %s2096_s29 = sld [smem:[#allocation6_spill]] }
 0x7c3   : > { %s2097_s30 = sld [smem:[#allocation8_spill]] }
 0x7c7   : > { %s25_s15 = sadd.s32 1, %s2095_s27  }
 0x7c8   : > { %p22_p1 = scmp.ge.s32.totalorder %s25_s15, 4  }
 0x7ca   :  { %24 = sbr.rel (!%p22_p1) target bundleno = 4 (0x4), region = 124 }
 0x7cf   :  { %1376 = vsyncpa [#allocation4], 1 }
 0x7d0   :  { %1378 = vsyncpa [#allocation4 + $0x1], 1 }

</bundles_post_ra>
